<compile_context>
chip_gen: v7x
topology: tpu7x:2x2x1
jax: 0.10.0
libtpu: 0.0.40
codegen_flags: <defaults>
</compile_context>

<pallas_src>
import jax
import jax.numpy as jnp
from jax.experimental import pallas as pl
from jax.experimental.pallas import tpu as pltpu

_EPS = 1e-5                       # BatchNorm1d default eps
_DROP_P = 0.4                     # nn.Dropout(p=0.4)
_KEEP_SCALE = 1.0 / (1.0 - _DROP_P)
_RND_BITS = 24
_DROP_THRESH = int(_DROP_P * (1 << _RND_BITS))   # keep iff rnd >= thresh
_LANES = 128                      # lane width -> lane-dense output tiles


def _mrna_kernel(x_ref, w_ref, b_ref, gamma_ref, beta_ref, rnd_ref, o_ref):
    # x: (B, K) f32, w: (K, TN), b/gamma/beta: (1, TN), rnd: (B, TN) int32
    x = x_ref[...].astype(jnp.float32)
    w = w_ref[...].astype(jnp.float32)

    # Linear: x @ W + b  (MXU)
    h = jnp.dot(x, w, preferred_element_type=jnp.float32) + b_ref[...]

    # BatchNorm1d, training mode: per-feature batch mean / biased variance,
    # one-pass form (E[h^2] - mean^2).
    inv_b = 1.0 / x.shape[0]
    s1 = jnp.sum(h, axis=0, keepdims=True)
    s2 = jnp.sum(h * h, axis=0, keepdims=True)
    mean = s1 * inv_b
    var = jnp.maximum(s2 * inv_b - mean * mean, 0.0)
    inv_std = jax.lax.rsqrt(var + _EPS)
    bn = (h - mean) * (gamma_ref[...] * inv_std) + beta_ref[...]

    # ReLU
    r = jnp.maximum(bn, 0.0)

    # Dropout p=0.4 (inverted dropout): integer-domain keep decision.
    keep = rnd_ref[...] >= _DROP_THRESH
    o_ref[...] = jnp.where(keep, r * _KEEP_SCALE, 0.0).astype(o_ref.dtype)


def mrna_net_forward(x, w, b, gamma, beta, dropout_key):
    """Training-mode MrnaNet forward.

    x:      (B, mrna_length) f32
    w:      (mrna_length, m_length) f32   (nn.Linear weight, pre-transposed)
    b:      (m_length,) f32               (nn.Linear bias)
    gamma:  (m_length,) f32               (BatchNorm1d weight)
    beta:   (m_length,) f32               (BatchNorm1d bias)
    dropout_key: jax PRNG key for the dropout mask
    """
    B, K = x.shape
    m_length = w.shape[1]

    # Pad the feature axis to a multiple of 128 so output stores are
    # lane-dense (unmasked vst, full-width DMA).  Padded columns are all-zero
    # and are sliced off at the end (they stay finite: h==0 -> h_hat==0).
    n_pad = pl.cdiv(m_length, _LANES) * _LANES
    pad = n_pad - m_length
    w_p = jnp.pad(w, ((0, 0), (0, pad)))
    b_p = jnp.pad(b.reshape(1, -1), ((0, 0), (0, pad)))
    g_p = jnp.pad(gamma.reshape(1, -1), ((0, 0), (0, pad)))
    be_p = jnp.pad(beta.reshape(1, -1), ((0, 0), (0, pad)))

    # Dropout randomness: uniform int32 in [0, 2^24), drawn once for the full
    # padded tile so the mask shape is stable across builds.
    # TODO(synk): bitwise reproduction of torch's dropout RNG stream is not
    # possible; Bernoulli(keep=0.6) + 1/0.6 scaling semantics match.
    rnd = jax.random.randint(
        dropout_key, (B, n_pad), 0, 1 << _RND_BITS, dtype=jnp.int32)

    grid = (n_pad // _LANES,)

    out = pl.pallas_call(
        _mrna_kernel,
        out_shape=jax.ShapeDtypeStruct((B, n_pad), jnp.float32),
        grid_spec=pltpu.PrefetchScalarGridSpec(
            num_scalar_prefetch=0,
            grid=grid,
            in_specs=[
                pl.BlockSpec((B, K), lambda j: (0, 0)),        # x (full batch)
                pl.BlockSpec((K, _LANES), lambda j: (0, j)),   # w feature tile
                pl.BlockSpec((1, _LANES), lambda j: (0, j)),   # b
                pl.BlockSpec((1, _LANES), lambda j: (0, j)),   # gamma
                pl.BlockSpec((1, _LANES), lambda j: (0, j)),   # beta
                pl.BlockSpec((B, _LANES), lambda j: (0, j)),   # dropout rnd
            ],
            out_specs=pl.BlockSpec((B, _LANES), lambda j: (0, j)),
        ),
        compiler_params=pltpu.CompilerParams(
            # Feature tiles are independent (per-feature BN stats) -> safe to
            # split across TensorCores on v7x; no-op on v5e/v6e.
            dimension_semantics=("parallel",)),
    )(x, w_p, b_p, g_p, be_p, rnd)

    return out[:, :m_length]


if __name__ == "__main__":
    # Small shapes consistent with the module: mrna_length=64, m_length=32.
    B, mrna_length, m_length = 8, 64, 32

    key = jax.random.PRNGKey(0)
    kx, kw, kb, kdrop = jax.random.split(key, 4)

    x = jax.random.normal(kx, (B, mrna_length), dtype=jnp.float32)

    # nn.Linear init (weight stored pre-transposed as (in, out)).
    bound = 1.0 / jnp.sqrt(mrna_length)
    w = jax.random.uniform(kw, (mrna_length, m_length), jnp.float32, -bound, bound)
    b = jax.random.uniform(kb, (m_length,), jnp.float32, -bound, bound)
    gamma = jnp.ones((m_length,), jnp.float32)    # BatchNorm1d default weight
    beta = jnp.zeros((m_length,), jnp.float32)    # BatchNorm1d default bias

    out = mrna_net_forward(x, w, b, gamma, beta, kdrop)
    jax.block_until_ready(out)

    assert out.shape == (B, m_length)
    assert jnp.all(jnp.isfinite(out))
    print("KERNEL_OK")
</pallas_src>

<mosaic_0001>
module attributes {stable_mosaic.version = 11 : i64} {
  func.func @_mrna_kernel(%arg0: i32, %arg1: memref<8x64xf32, #tpu.memory_space<vmem>>, %arg2: memref<64x128xf32, #tpu.memory_space<vmem>>, %arg3: memref<1x128xf32, #tpu.memory_space<vmem>>, %arg4: memref<1x128xf32, #tpu.memory_space<vmem>>, %arg5: memref<1x128xf32, #tpu.memory_space<vmem>>, %arg6: memref<8x128xi32, #tpu.memory_space<vmem>>, %arg7: memref<8x128xf32, #tpu.memory_space<vmem>>) attributes {dimension_semantics = [#tpu.dimension_semantics<parallel>], iteration_bounds = array<i64: 1>, scalar_prefetch = 0 : i64, scratch_operands = 0 : i64, tpu.core_type = #tpu.core_type<tc>, window_params = [{pipeline_mode = #tpu.pipeline_mode<synchronous>, transform_indices = @transform_0, window_bounds = array<i64: 8, 64>}, {transform_indices = @transform_1, window_bounds = array<i64: 64, 128>}, {transform_indices = @transform_2, window_bounds = array<i64: 1, 128>}, {transform_indices = @transform_3, window_bounds = array<i64: 1, 128>}, {transform_indices = @transform_4, window_bounds = array<i64: 1, 128>}, {transform_indices = @transform_5, window_bounds = array<i64: 8, 128>}, {transform_indices = @transform_6, window_bounds = array<i64: 8, 128>}]} {
    %c0 = arith.constant 0 : index
    %c0_0 = arith.constant 0 : index
    %0 = vector.load %arg1[%c0, %c0_0] : memref<8x64xf32, #tpu.memory_space<vmem>>, vector<8x64xf32>
    %c0_1 = arith.constant 0 : index
    %c0_2 = arith.constant 0 : index
    %1 = vector.load %arg2[%c0_1, %c0_2] : memref<64x128xf32, #tpu.memory_space<vmem>>, vector<64x128xf32>
    %cst = arith.constant dense<0.000000e+00> : vector<8x128xf32>
    %2 = tpu.matmul %0, %1, %cst {dimension_numbers = #tpu.dot_dimension_numbers<[1], [0], [0], [1], [0, 0, 1, 1], [], []>} : vector<8x64xf32>, vector<64x128xf32>, vector<8x128xf32> -> vector<8x128xf32>
    %c0_3 = arith.constant 0 : index
    %c0_4 = arith.constant 0 : index
    %3 = vector.load %arg3[%c0_3, %c0_4] : memref<1x128xf32, #tpu.memory_space<vmem>>, vector<1x128xf32>
    %4 = vector.broadcast %3 : vector<1x128xf32> to vector<8x128xf32>
    %5 = arith.addf %2, %4 : vector<8x128xf32>
    %cst_5 = arith.constant dense<0.000000e+00> : vector<128xf32>
    %6 = vector.multi_reduction <add>, %5, %cst_5 [0] : vector<8x128xf32> to vector<128xf32>
    %7 = vector.shape_cast %6 : vector<128xf32> to vector<1x128xf32>
    %8 = arith.mulf %5, %5 : vector<8x128xf32>
    %cst_6 = arith.constant dense<0.000000e+00> : vector<128xf32>
    %9 = vector.multi_reduction <add>, %8, %cst_6 [0] : vector<8x128xf32> to vector<128xf32>
    %10 = vector.shape_cast %9 : vector<128xf32> to vector<1x128xf32>
    %cst_7 = arith.constant 1.250000e-01 : f32
    %11 = vector.broadcast %cst_7 : f32 to vector<1x128xf32>
    %12 = arith.mulf %7, %11 : vector<1x128xf32>
    %cst_8 = arith.constant 1.250000e-01 : f32
    %13 = vector.broadcast %cst_8 : f32 to vector<1x128xf32>
    %14 = arith.mulf %10, %13 : vector<1x128xf32>
    %15 = arith.mulf %12, %12 : vector<1x128xf32>
    %16 = arith.subf %14, %15 : vector<1x128xf32>
    %cst_9 = arith.constant 0.000000e+00 : f32
    %17 = vector.broadcast %cst_9 : f32 to vector<1x128xf32>
    %18 = arith.maximumf %16, %17 : vector<1x128xf32>
    %cst_10 = arith.constant 9.99999974E-6 : f32
    %19 = vector.broadcast %cst_10 : f32 to vector<1x128xf32>
    %20 = arith.addf %18, %19 : vector<1x128xf32>
    %21 = math.rsqrt %20 : vector<1x128xf32>
    %22 = vector.broadcast %12 : vector<1x128xf32> to vector<8x128xf32>
    %23 = arith.subf %5, %22 : vector<8x128xf32>
    %c0_11 = arith.constant 0 : index
    %c0_12 = arith.constant 0 : index
    %24 = vector.load %arg4[%c0_11, %c0_12] : memref<1x128xf32, #tpu.memory_space<vmem>>, vector<1x128xf32>
    %25 = arith.mulf %24, %21 : vector<1x128xf32>
    %26 = vector.broadcast %25 : vector<1x128xf32> to vector<8x128xf32>
    %27 = arith.mulf %23, %26 : vector<8x128xf32>
    %c0_13 = arith.constant 0 : index
    %c0_14 = arith.constant 0 : index
    %28 = vector.load %arg5[%c0_13, %c0_14] : memref<1x128xf32, #tpu.memory_space<vmem>>, vector<1x128xf32>
    %29 = vector.broadcast %28 : vector<1x128xf32> to vector<8x128xf32>
    %30 = arith.addf %27, %29 : vector<8x128xf32>
    %cst_15 = arith.constant 0.000000e+00 : f32
    %31 = vector.broadcast %cst_15 : f32 to vector<8x128xf32>
    %32 = arith.maximumf %30, %31 : vector<8x128xf32>
    %c0_16 = arith.constant 0 : index
    %c0_17 = arith.constant 0 : index
    %33 = vector.load %arg6[%c0_16, %c0_17] : memref<8x128xi32, #tpu.memory_space<vmem>>, vector<8x128xi32>
    %c6710886_i32 = arith.constant 6710886 : i32
    %34 = vector.broadcast %c6710886_i32 : i32 to vector<8x128xi32>
    %35 = arith.cmpi sge, %33, %34 : vector<8x128xi32>
    %cst_18 = arith.constant 1.66666663 : f32
    %36 = vector.broadcast %cst_18 : f32 to vector<8x128xf32>
    %37 = arith.mulf %32, %36 : vector<8x128xf32>
    %cst_19 = arith.constant 0.000000e+00 : f32
    %38 = vector.broadcast %cst_19 : f32 to vector<8x128xf32>
    %39 = arith.select %35, %37, %38 : vector<8x128xi1>, vector<8x128xf32>
    %c0_20 = arith.constant 0 : index
    %c0_21 = arith.constant 0 : index
    %40 = vector.load %arg7[%c0_20, %c0_21] : memref<8x128xf32, #tpu.memory_space<vmem>>, vector<8x128xf32>
    tpu.vector_store %arg7[%c0_20, %c0_21], %39 {strides = array<i32>} : memref<8x128xf32, #tpu.memory_space<vmem>>, vector<8x128xf32>,
    return
  }
  func.func @transform_0(%arg0: i32) -> (i32, i32) {
    %c0_i32 = arith.constant 0 : i32
    %c0_i32_0 = arith.constant 0 : i32
    %c0_i32_1 = arith.constant 0 : i32
    return %c0_i32, %c0_i32_0 : i32, i32
  }
  func.func @transform_1(%arg0: i32) -> (i32, i32) {
    %c0_i32 = arith.constant 0 : i32
    %c0_i32_0 = arith.constant 0 : i32
    return %c0_i32, %arg0 : i32, i32
  }
  func.func @transform_2(%arg0: i32) -> (i32, i32) {
    %c0_i32 = arith.constant 0 : i32
    %c0_i32_0 = arith.constant 0 : i32
    return %c0_i32, %arg0 : i32, i32
  }
  func.func @transform_3(%arg0: i32) -> (i32, i32) {
    %c0_i32 = arith.constant 0 : i32
    %c0_i32_0 = arith.constant 0 : i32
    return %c0_i32, %arg0 : i32, i32
  }
  func.func @transform_4(%arg0: i32) -> (i32, i32) {
    %c0_i32 = arith.constant 0 : i32
    %c0_i32_0 = arith.constant 0 : i32
    return %c0_i32, %arg0 : i32, i32
  }
  func.func @transform_5(%arg0: i32) -> (i32, i32) {
    %c0_i32 = arith.constant 0 : i32
    %c0_i32_0 = arith.constant 0 : i32
    return %c0_i32, %arg0 : i32, i32
  }
  func.func @transform_6(%arg0: i32) -> (i32, i32) {
    %c0_i32 = arith.constant 0 : i32
    %c0_i32_0 = arith.constant 0 : i32
    return %c0_i32, %arg0 : i32, i32
  }
}

</mosaic_0001>

<bundles_post_ra>
// kernel: tpu_custom_call.1
= control target key start
LH: loop header
LB: loop body
LE: loop exit
PB: predicated region body
PF: predicated region fallthrough
CT: control target
= control target key end

     0   :  { %11 = vsyncpa [#allocation3], 0  ;;  %s423_s0 = inlined_call_operand.hbm [shape: f32[8,64], index: 0, kind: input, shape index: {}]   ;;  %s424_s1 = inlined_call_operand.hbm [shape: f32[64,128], index: 1, kind: input, shape index: {}]   ;;  %s425_s2 = inlined_call_operand.vmem [shape: f32[1,128], index: 2, kind: input, shape index: {}]   ;;  %s426_s3 = inlined_call_operand.vmem [shape: f32[1,128], index: 3, kind: input, shape index: {}]   ;;  %s427_s4 = inlined_call_operand.vmem [shape: f32[1,128], index: 4, kind: input, shape index: {}]   ;;  %s428_s5 = inlined_call_operand.vmem [shape: s32[8,128], index: 5, kind: input, shape index: {}]   ;;  %s429_s6 = inlined_call_operand.hbm [shape: f32[8,128], index: 6, kind: output, shape index: {}]  }
   0x1   :  { %12 = vsyncpa [#allocation6], 0 }
   0x2   :  { %13 = vsyncpa [#allocation4], 0  ;;  %s325_s21 = smov [#allocation2]   ;;  %s326_s23 = smov [#allocation5]  }
   0x3   :  { %s20_s22 = sshll.u32 %s325_s21, 4  ;;  %s29_s24 = sshll.u32 %s326_s23, 4  ;;  %s21_s22 = int_to_ptr.vmem [resolvable:$true] %s20_s22  ;;  %s368_s24 = int_to_ptr.vmem [resolvable:$true] %s29_s24 }
   0x4   :  { %s253_s27 = scalar_lea.hbm %s423_s0, 128 }
   0x5   :  { %p254_p0 = scmp.ne.s32.totalorder %s423_s0, %s253_s27  ;;  %p257_p1 = scmp.lt.u32.totalorder %s253_s27, %s423_s0 }
   0x7   :  { %p259_p2 = pnand %p257_p1, %p254_p0 }
   0x9   :  { %262 = shalt.err (!%p259_p2)
}
   0xa   :  { %s263_s8 = scalar_lea.vmem %s21_s22, 128  ;;  %p268_p4 = scmp.lt.s32.totalorder %s21_s22, %s21_s22 }
   0xb   :  { %p264_p3 = scmp.ne.s32.totalorder %s21_s22, %s263_s8  ;;  %p269_p5 = scmp.lt.s32.totalorder %s263_s8, %s263_s8 }
   0xd   :  { %p270_p6 = por %p269_p5, %p268_p4 }
   0xf   :  { %p271_p7 = pnand %p270_p6, %p264_p3 }
  0x11   :  { %274 = shalt.err (!%p271_p7)
}
  0x12   :  { %23 = dma.hbm_to_vmem [thread:$0]  %s423_s0, 128, %s21_s22, [#allocation3]  }
  0x13   :  { %s275_s13 = scalar_lea.hbm %s424_s1, 1024 }
  0x14   :  { %p276_p8 = scmp.ne.s32.totalorder %s424_s1, %s275_s13  ;;  %p279_p9 = scmp.lt.u32.totalorder %s275_s13, %s424_s1 }
  0x16   :  { %p281_p10 = pnand %p279_p9, %p276_p8 }
  0x18   :  { %284 = shalt.err (!%p281_p10)
}
  0x19   :  { %s285_s18 = scalar_lea.vmem %s368_s24, 1024  ;;  %p290_p12 = scmp.lt.s32.totalorder %s368_s24, %s368_s24 }
  0x1a   :  { %p286_p11 = scmp.ne.s32.totalorder %s368_s24, %s285_s18  ;;  %p291_p13 = scmp.lt.s32.totalorder %s285_s18, %s285_s18 }
  0x1c   :  { %p292_p0 = por %p291_p13, %p290_p12 }
  0x1e   :  { %p293_p1 = pnand %p292_p0, %p286_p11 }
  0x20   :  { %296 = shalt.err (!%p293_p1)
}
  0x21   :  { %s327_s0 = smov 128   ;;  %s328_s19 = smov 8  }
  0x22   :  { %35 = dma.hbm_to_vmem [thread:$0]  %s424_s1, 1024, %s368_s24, [#allocation6], %s327_s0, %s327_s0, %s328_s19  }
  0x23   :  { %319 = dma.done.wait [#allocation3], 128  }
  0x24   :  { %320 = vsyncadd [#allocation3], 4294967168 }
  0x25   :  { %321 = dma.done.wait [#allocation6], 1024  }
  0x26   :  { %322 = vsyncadd [#allocation6], 4294966272  ;;  %v329_v0 = vmov 0.0|0.0   ;;  %vm330_vm0 = vmmov 0   ;;  %v331_v1 = vmov 0.0   ;;  %v51_v2 = vld [vmem:[#allocation5] sm:$0xff]  ;;  %v164_v38 = vlaneseq }
  0x27   :  { %231 = vmatprep.subr.bf16.mxu0 %v329_v0  ;;  %228 = vmatprep.mubr.msk.f32.mxu0 %vm330_vm0, %v331_v1  ;;  %v52_v3 = vld [vmem:[#allocation5 + $0x8] sm:$0xff]  ;;  %v53_v4 = vld [vmem:[#allocation5 + $0x10] sm:$0xff]  ;;  %v54_v6 = vld [vmem:[#allocation5 + $0x18] sm:$0xff]  ;;  %vm66_vm1 = vcmask 523264   ;;  %s332_s28 = smov [#allocation7]  }
  0x28   :  { %v232_v5 = vpack.c.bf16 %v52_v3, %v51_v2  ;;  %v235_v7 = vpack.c.bf16 %v54_v6, %v53_v4  ;;  %v55_v8 = vld [vmem:[#allocation5 + $0x20] sm:$0xff]  ;;  %v56_v9 = vld [vmem:[#allocation5 + $0x28] sm:$0xff]  ;;  %v57_v11 = vld [vmem:[#allocation5 + $0x30] sm:$0xff]  ;;  %v165_v39 = vshrl.u32 %v164_v38, 7  ;;  %s190_s29 = sshll.u32 %s332_s28, 4  ;;  %s191_s29 = int_to_ptr.vmem [resolvable:$true] %s190_s29 }
  0x29   :  { %v238_v10 = vpack.c.bf16 %v56_v9, %v55_v8  ;;  %v58_v12 = vld [vmem:[#allocation5 + $0x38] sm:$0xff]  ;;  %p302_p3 = scmp.lt.s32.totalorder %s191_s29, %s191_s29 }
  0x2a   :  { %233 = vmatpush3.bf16.msra.mxu0 %v232_v5  ;;  %v241_v13 = vpack.c.bf16 %v58_v12, %v57_v11  ;;  %v50_v14 = vld [vmem:[#allocation2] sm:$0xff]  ;;  %v166_v41 = vsub.s32 0, %v165_v39 }
  0x2b   :  { %234 = vmatprep.subr.bf16.mxu0 %v329_v0  ;;  %v200_v15 = vld [vmem:[%s425_s2] ss:$0 sm:$0xff] }
  0x2c   :  { %v161_v40 = vld [vmem:[%s426_s3] sm:$0x1]  ;;  %s297_s3 = scalar_lea.vmem %s191_s29, 128 }
  0x2d   :  { %v202_v46 = vld [vmem:[%s427_s4] ss:$0 sm:$0xff]  ;;  %p298_p2 = scmp.ne.s32.totalorder %s191_s29, %s297_s3  ;;  %p303_p4 = scmp.lt.s32.totalorder %s297_s3, %s297_s3 }
  0x2e   :  { %236 = vmatpush3.bf16.msra.mxu0 %v235_v7  ;;  %v179_v49 = vld [vmem:[%s428_s5] sm:$0xff] }
  0x2f   :  { %237 = vmatprep.subr.bf16.mxu0 %v329_v0  ;;  %vm180_vm2 = vcmp.ge.s32.totalorder %v179_v49, 6710886  ;;  %p304_p5 = por %p303_p4, %p302_p3 }
  0x31   :  { %p305_p6 = pnand %p304_p5, %p298_p2 }
  0x32   :  { %239 = vmatpush3.bf16.msra.mxu0 %v238_v10 }
  0x33   :  { %240 = vmatprep.subr.bf16.mxu0 %v329_v0 }
  0x36   :  { %242 = vmatpush3.bf16.msra.mxu0 %v241_v13 }
  0x39   :  { %229 = vmatmul.mubr.msk.f32.vlgmr.msra.gmra.mrb[0].mxu0 %vm66_vm1, %v50_v14 }
 0x10c   :  { %v136_v16 = vpop.f32.mrb[0].mxu0 }
 0x10d   :  { %v137_v17 = vadd.f32 %v200_v15, %v136_v16  ;;  %v230_v18 = vpop.f32.mrb[1].mxu0 }
 0x10f   :  { %v140_v19 = vrot.slane %v137_v17, 4  ;;  %v146_v20 = vmul.f32 %v137_v17, %v137_v17 }
 0x111   :  { %v141_v21 = vadd.f32 %v140_v19, %v137_v17  ;;  %v147_v22 = vrot.slane %v146_v20, 4 }
 0x113   :  { %v142_v23 = vrot.slane %v141_v21, 2  ;;  %v148_v24 = vadd.f32 %v147_v22, %v146_v20 }
 0x115   :  { %v143_v25 = vadd.f32 %v142_v23, %v141_v21  ;;  %v149_v26 = vrot.slane %v148_v24, 2 }
 0x117   :  { %v144_v27 = vrot.slane %v143_v25, 1  ;;  %v150_v28 = vadd.f32 %v149_v26, %v148_v24 }
 0x119   :  { %v145_v29 = vadd.f32 %v144_v27, %v143_v25  ;;  %v151_v30 = vrot.slane %v150_v28, 1 }
 0x11b   :  { %v152_v31 = vadd.f32 %v151_v30, %v150_v28  ;;  %v153_v32 = vmul.f32 0.125, %v145_v29 }
 0x11d   :  { %v154_v33 = vmul.f32 0.125, %v152_v31  ;;  %v155_v34 = vmul.f32 %v153_v32, %v153_v32  ;;  %v160_v44 = vsub.f32 %v137_v17, %v153_v32 }
 0x11f   :  { %v156_v35 = vsub.f32 %v154_v33, %v155_v34 }
 0x121   :  { %v157_v36 = vmax.f32 %v156_v35, 0.0 }
 0x123   :  { %v158_v37 = vadd.f32 1e-05, %v157_v36 }
 0x125   :  { %251 = vrsqrt.f32 %v158_v37 }
 0x12f   :  { %v252_v42 = vpop.eup %251 }
 0x130   :  { %v162_v43 = vmul.f32 %v252_v42, %v161_v40 }
 0x132   :  { %v167_v45 = vrot.slane %v162_v43, %v166_v41 }
 0x134   :  { %v169_v47 = vmul.f32 %v167_v45, %v160_v44 }
 0x136   :  { %v177_v48 = vadd.f32 %v202_v46, %v169_v47 }
 0x138   :  { %v178_v50 = vmax.f32 %v177_v48, 0.0 }
 0x13a   :  { %v181_v51 = vmul.f32 1.6666666, %v178_v50 }
 0x13c   :  { %v182_v52 = vsel %vm180_vm2, %v181_v51, 0.0 }
 0x13d   :  { %183 = vst [vmem:[#allocation7] sm:$0xff] %v182_v52 }
 0x13e   :  { %308 = shalt.err (!%p305_p6)
}
 0x13f   :  { %s309_s7 = scalar_lea.hbm %s429_s6, 128 }
 0x140   :  { %p310_p7 = scmp.ne.s32.totalorder %s429_s6, %s309_s7  ;;  %p313_p8 = scmp.lt.u32.totalorder %s309_s7, %s429_s6 }
 0x142   :  { %p315_p9 = pnand %p313_p8, %p310_p7 }
 0x144   :  { %318 = shalt.err (!%p315_p9)
}
 0x145   :  { %193 = dma.vmem_to_hbm [thread:$0]  %s191_s29, 128, %s429_s6, [#allocation4]  }
 0x146   :  { %323 = dma.done.wait [#allocation4], 128  }
 0x147   :  { %324 = vsyncadd [#allocation4], 4294967168 }
 0x148   :  { %197 = vsyncpa [#allocation3], 1 }
 0x149   :  { %198 = vsyncpa [#allocation6], 1 }
 0x14a   :  { %199 = vsyncpa [#allocation4], 1 }

</bundles_post_ra>
